<compile_context>
chip_gen: v5e
topology: v5e:2x2
jax: 0.10.0
libtpu: 0.0.40
codegen_flags: <defaults>
</compile_context>

<pallas_src>
import functools

import jax
import jax.numpy as jnp
from jax.experimental import pallas as pl
from jax.experimental.pallas import tpu as pltpu


def _feature_map_mlp_kernel(*refs, g, has_bias):
    # With bias:    (bias_ref[SMEM (H,)], x_ref, w_ref, o_ref)
    # Without bias: (x_ref, w_ref, o_ref)
    # x_ref: (G, TL, D)  w_ref: (G, D, F)  o_ref: (G, TL, F)
    if has_bias:
        bias_ref, x_ref, w_ref, o_ref = refs
        h0 = pl.program_id(0) * g
    else:
        x_ref, w_ref, o_ref = refs
        bias_ref = None
    for i in range(g):                              # static unroll over packed heads
        yi = jnp.dot(x_ref[i], w_ref[i], preferred_element_type=jnp.float32)
        if has_bias:
            yi = yi + bias_ref[h0 + i]
        o_ref[i] = yi.astype(o_ref.dtype)


def _vmem_capacity_bytes():
    try:
        return int(pltpu.get_tpu_info().vmem_capacity_bytes)
    except Exception:
        return 64 << 20   # conservative (v7x per-TC) fallback


def _choose_tiles(L, D, F, H, x_isz, o_isz, w_isz, budget_bytes, max_rows=8192):
    """Pick (TL, G): sequence-tile rows per step and heads packed per step."""
    # Per sequence-row VMEM at G=1: double-buffered x/out tiles + f32 temporaries.
    per_row = 2 * (D * x_isz + F * o_isz) + 4 * (D + F)
    w_bytes = 2 * D * F * w_isz
    avail = max(budget_bytes - w_bytes, per_row * 8)
    tl = min(L, max_rows, max(8, avail // per_row))
    if tl < L:
        # long-sequence path: big, DMA-friendly sequence tiles, one head per step
        if tl >= 512:
            tl = (tl // 512) * 512
        else:
            tl = max(8, (tl // 8) * 8)
        return tl, 1
    # Whole sequence fits in one tile: pack G heads per step to amortize the
    # fixed per-step pipeline overhead.
    tl = L

    def step_bytes(g):
        return (2 * g * tl * (D * x_isz + F * o_isz)   # x/out double-buffered
                + 2 * g * D * F * w_isz                # W double-buffered
                + g * tl * 4 * (D + F))                # f32 intermediates (conservative)

    g = 1
    for cand in range(2, min(H, 8) + 1):
        if H % cand == 0 and step_bytes(cand) <= budget_bytes:
            g = cand
    return tl, g


def feature_map_mlp(x, layer, bias=None, *, skip_connection=False):
    """
    x:     (B, H, L, D)
    layer: (H, D, F)
    bias:  (H,) per-head scalar bias, or None if the module has bias=False
    """
    B, H, L, D = x.shape
    Hw, Dw, F = layer.shape
    assert (Hw, Dw) == (H, D)
    if skip_connection:
        assert D == F, (
            f"If skip_connection we need head_dim == feature_dim but "
            f"head_dim is {D} != feature_dim is {F}"
        )
        # Fold the residual into the weights: x @ (W + I) == x @ W + x.
        eye = jnp.eye(D, F, dtype=jnp.float32)
        layer_eff = (layer.astype(jnp.float32) + eye).astype(layer.dtype)
    else:
        layer_eff = layer

    has_bias = bias is not None
    out_dtype = x.dtype
    x_isz = jnp.dtype(x.dtype).itemsize
    o_isz = jnp.dtype(out_dtype).itemsize
    w_isz = jnp.dtype(layer_eff.dtype).itemsize

    vmem_cap = _vmem_capacity_bytes()
    budget = (vmem_cap * 2) // 5                       # ~40% of physical VMEM
    TL, G = _choose_tiles(L, D, F, H, x_isz, o_isz, w_isz, budget)
    n_l = pl.cdiv(L, TL)

    kernel = functools.partial(_feature_map_mlp_kernel, g=G, has_bias=has_bias)

    # VMEM actually needed: double-buffered x/out/W blocks + f32 intermediates.
    vmem_needed = (2 * G * TL * (D * x_isz + F * o_isz)
                   + 2 * G * D * F * w_isz
                   + TL * 4 * (D + F))
    vmem_limit = int(min(max(2 * vmem_needed, 16 << 20), (vmem_cap * 3) // 5))

    flops = 2 * B * H * L * D * F
    bytes_accessed = (x.size * x_isz + layer_eff.size * w_isz
                      + B * H * L * F * o_isz + (H * 4 if has_bias else 0))

    in_specs = [
        # x: one (G, TL, D) tile per (head-group, batch, seq-tile)
        pl.BlockSpec((None, G, TL, D), lambda h, b, l, *_: (b, h, l, 0)),
        # W: one (G, D, F) tile per head-group (reused across b, l since the
        # head-group axis is the slowest grid axis -> DMA skipped when unchanged)
        pl.BlockSpec((G, D, F), lambda h, b, l, *_: (h, 0, 0)),
    ]
    out_specs = pl.BlockSpec((None, G, TL, F), lambda h, b, l, *_: (b, h, l, 0))

    grid_spec = pltpu.PrefetchScalarGridSpec(
        num_scalar_prefetch=1 if has_bias else 0,
        grid=(H // G, B, n_l),
        in_specs=in_specs,
        out_specs=out_specs,
    )

    call = pl.pallas_call(
        kernel,
        out_shape=jax.ShapeDtypeStruct((B, H, L, F), out_dtype),
        grid_spec=grid_spec,
        compiler_params=pltpu.CompilerParams(
            dimension_semantics=("parallel", "parallel", "parallel"),
            vmem_limit_bytes=vmem_limit,
        ),
        cost_estimate=pl.CostEstimate(flops=flops, transcendentals=0,
                                      bytes_accessed=bytes_accessed),
    )

    if has_bias:
        bias_sm = bias.reshape(H).astype(jnp.float32)
        return call(bias_sm, x, layer_eff)
    return call(x, layer_eff)


def init_feature_map_mlp_params(key, num_heads, head_dim, feature_dim,
                                dtype=jnp.float32, use_bias=False,
                                zero_init=False, normal_init=False,
                                skip_connection=False):
    """Deterministic parameter init mirroring the torch module's __init__."""
    k_w, k_b = jax.random.split(key)
    # kaiming_uniform_ on a 3-D tensor (H, D, F): fan_in = D * F, gain = sqrt(2)
    fan_in = head_dim * feature_dim
    bound = jnp.sqrt(2.0) * jnp.sqrt(3.0 / fan_in)
    layer = jax.random.uniform(k_w, (num_heads, head_dim, feature_dim),
                               dtype=jnp.float32, minval=-bound, maxval=bound)
    if zero_init:
        if skip_connection:
            layer = jnp.zeros_like(layer)
        else:
            eye = jnp.eye(head_dim, feature_dim, dtype=jnp.float32)
            layer = jnp.broadcast_to(eye, (num_heads, head_dim, feature_dim))
    if normal_init:
        layer = jax.random.normal(k_w, (num_heads, head_dim, feature_dim),
                                  dtype=jnp.float32)
    layer = layer.astype(dtype)

    if use_bias:
        # torch bias shape is (1, H, 1, 1) -> one scalar per head
        b_bound = jnp.sqrt(2.0) * jnp.sqrt(3.0 / 1.0)
        bias = jax.random.uniform(k_b, (num_heads,), dtype=jnp.float32,
                                  minval=-b_bound, maxval=b_bound).astype(dtype)
    else:
        bias = None   # bias = 0.0 in torch
    return layer, bias


def _reference(x, layer, bias, skip_connection):
    y = jnp.einsum('hdf,bhld->bhlf', layer, x)
    if bias is not None:
        y = y + bias.reshape(1, -1, 1, 1)
    return x + y if skip_connection else y


if __name__ == "__main__":
    # Small shapes consistent with the module's forward contract.
    B, H, L, D = 2, 4, 128, 64

    key = jax.random.PRNGKey(0)
    k_x, k_p = jax.random.split(key)
    x = jax.random.normal(k_x, (B, H, L, D), dtype=jnp.float32)

    configs = [
        dict(feature_dim=64, skip_connection=False, use_bias=False),
        dict(feature_dim=64, skip_connection=True, use_bias=True),
        dict(feature_dim=128, skip_connection=False, use_bias=True),
    ]

    ok = True
    for cfg in configs:
        F = cfg["feature_dim"]
        layer, bias = init_feature_map_mlp_params(
            k_p, num_heads=H, head_dim=D, feature_dim=F,
            dtype=jnp.float32, use_bias=cfg["use_bias"],
            skip_connection=cfg["skip_connection"])

        out = feature_map_mlp(x, layer, bias,
                              skip_connection=cfg["skip_connection"])
        out = jax.block_until_ready(out)

        ref = _reference(x, layer, bias, cfg["skip_connection"])
        ok = ok and (out.shape == (B, H, L, F))
        ok = ok and bool(jnp.allclose(out, ref, atol=2e-4, rtol=2e-4))

    assert ok
    print("KERNEL_OK")
</pallas_src>

<mosaic_0001>
module attributes {stable_mosaic.version = 11 : i64} {
  func.func @_feature_map_mlp_kernel(%arg0: i32, %arg1: i32, %arg2: i32, %arg3: memref<1x4x128x64xf32, #tpu.memory_space<vmem>>, %arg4: memref<4x64x64xf32, #tpu.memory_space<vmem>>, %arg5: memref<1x4x128x64xf32, #tpu.memory_space<vmem>>) attributes {dimension_semantics = [#tpu.dimension_semantics<parallel>, #tpu.dimension_semantics<parallel>, #tpu.dimension_semantics<parallel>], iteration_bounds = array<i64: 1, 2, 1>, scalar_prefetch = 0 : i64, scratch_operands = 0 : i64, tpu.core_type = #tpu.core_type<tc>, window_params = [{transform_indices = @transform_0, window_bounds = array<i64: 1, 4, 128, 64>}, {transform_indices = @transform_1, window_bounds = array<i64: 4, 64, 64>}, {transform_indices = @transform_2, window_bounds = array<i64: 1, 4, 128, 64>}]} {
    %c0 = arith.constant 0 : index
    %c0_0 = arith.constant 0 : index
    %c0_1 = arith.constant 0 : index
    %c0_2 = arith.constant 0 : index
    %0 = vector.load %arg3[%c0, %c0_0, %c0_1, %c0_2] : memref<1x4x128x64xf32, #tpu.memory_space<vmem>>, vector<1x1x128x64xf32>
    %1 = vector.shape_cast %0 : vector<1x1x128x64xf32> to vector<128x64xf32>
    %c0_3 = arith.constant 0 : index
    %c0_4 = arith.constant 0 : index
    %c0_5 = arith.constant 0 : index
    %2 = vector.load %arg4[%c0_3, %c0_4, %c0_5] : memref<4x64x64xf32, #tpu.memory_space<vmem>>, vector<1x64x64xf32>
    %3 = vector.shape_cast %2 : vector<1x64x64xf32> to vector<64x64xf32>
    %cst = arith.constant dense<0.000000e+00> : vector<128x64xf32>
    %4 = tpu.matmul %1, %3, %cst {dimension_numbers = #tpu.dot_dimension_numbers<[1], [0], [0], [1], [0, 0, 1, 1], [], []>} : vector<128x64xf32>, vector<64x64xf32>, vector<128x64xf32> -> vector<128x64xf32>
    %c0_6 = arith.constant 0 : index
    %c0_7 = arith.constant 0 : index
    %c0_8 = arith.constant 0 : index
    %c0_9 = arith.constant 0 : index
    %5 = vector.load %arg5[%c0_6, %c0_7, %c0_8, %c0_9] : memref<1x4x128x64xf32, #tpu.memory_space<vmem>>, vector<1x1x128x64xf32>
    %6 = vector.shape_cast %5 : vector<1x1x128x64xf32> to vector<128x64xf32>
    %7 = vector.shape_cast %4 : vector<128x64xf32> to vector<1x1x128x64xf32>
    tpu.vector_store %arg5[%c0_6, %c0_7, %c0_8, %c0_9], %7 {strides = array<i32>} : memref<1x4x128x64xf32, #tpu.memory_space<vmem>>, vector<1x1x128x64xf32>,
    %c0_10 = arith.constant 0 : index
    %c1 = arith.constant 1 : index
    %c0_11 = arith.constant 0 : index
    %c0_12 = arith.constant 0 : index
    %8 = vector.load %arg3[%c0_10, %c1, %c0_11, %c0_12] : memref<1x4x128x64xf32, #tpu.memory_space<vmem>>, vector<1x1x128x64xf32>
    %9 = vector.shape_cast %8 : vector<1x1x128x64xf32> to vector<128x64xf32>
    %c1_13 = arith.constant 1 : index
    %c0_14 = arith.constant 0 : index
    %c0_15 = arith.constant 0 : index
    %10 = vector.load %arg4[%c1_13, %c0_14, %c0_15] : memref<4x64x64xf32, #tpu.memory_space<vmem>>, vector<1x64x64xf32>
    %11 = vector.shape_cast %10 : vector<1x64x64xf32> to vector<64x64xf32>
    %cst_16 = arith.constant dense<0.000000e+00> : vector<128x64xf32>
    %12 = tpu.matmul %9, %11, %cst_16 {dimension_numbers = #tpu.dot_dimension_numbers<[1], [0], [0], [1], [0, 0, 1, 1], [], []>} : vector<128x64xf32>, vector<64x64xf32>, vector<128x64xf32> -> vector<128x64xf32>
    %c0_17 = arith.constant 0 : index
    %c1_18 = arith.constant 1 : index
    %c0_19 = arith.constant 0 : index
    %c0_20 = arith.constant 0 : index
    %13 = vector.load %arg5[%c0_17, %c1_18, %c0_19, %c0_20] : memref<1x4x128x64xf32, #tpu.memory_space<vmem>>, vector<1x1x128x64xf32>
    %14 = vector.shape_cast %13 : vector<1x1x128x64xf32> to vector<128x64xf32>
    %15 = vector.shape_cast %12 : vector<128x64xf32> to vector<1x1x128x64xf32>
    tpu.vector_store %arg5[%c0_17, %c1_18, %c0_19, %c0_20], %15 {strides = array<i32>} : memref<1x4x128x64xf32, #tpu.memory_space<vmem>>, vector<1x1x128x64xf32>,
    %c0_21 = arith.constant 0 : index
    %c2 = arith.constant 2 : index
    %c0_22 = arith.constant 0 : index
    %c0_23 = arith.constant 0 : index
    %16 = vector.load %arg3[%c0_21, %c2, %c0_22, %c0_23] : memref<1x4x128x64xf32, #tpu.memory_space<vmem>>, vector<1x1x128x64xf32>
    %17 = vector.shape_cast %16 : vector<1x1x128x64xf32> to vector<128x64xf32>
    %c2_24 = arith.constant 2 : index
    %c0_25 = arith.constant 0 : index
    %c0_26 = arith.constant 0 : index
    %18 = vector.load %arg4[%c2_24, %c0_25, %c0_26] : memref<4x64x64xf32, #tpu.memory_space<vmem>>, vector<1x64x64xf32>
    %19 = vector.shape_cast %18 : vector<1x64x64xf32> to vector<64x64xf32>
    %cst_27 = arith.constant dense<0.000000e+00> : vector<128x64xf32>
    %20 = tpu.matmul %17, %19, %cst_27 {dimension_numbers = #tpu.dot_dimension_numbers<[1], [0], [0], [1], [0, 0, 1, 1], [], []>} : vector<128x64xf32>, vector<64x64xf32>, vector<128x64xf32> -> vector<128x64xf32>
    %c0_28 = arith.constant 0 : index
    %c2_29 = arith.constant 2 : index
    %c0_30 = arith.constant 0 : index
    %c0_31 = arith.constant 0 : index
    %21 = vector.load %arg5[%c0_28, %c2_29, %c0_30, %c0_31] : memref<1x4x128x64xf32, #tpu.memory_space<vmem>>, vector<1x1x128x64xf32>
    %22 = vector.shape_cast %21 : vector<1x1x128x64xf32> to vector<128x64xf32>
    %23 = vector.shape_cast %20 : vector<128x64xf32> to vector<1x1x128x64xf32>
    tpu.vector_store %arg5[%c0_28, %c2_29, %c0_30, %c0_31], %23 {strides = array<i32>} : memref<1x4x128x64xf32, #tpu.memory_space<vmem>>, vector<1x1x128x64xf32>,
    %c0_32 = arith.constant 0 : index
    %c3 = arith.constant 3 : index
    %c0_33 = arith.constant 0 : index
    %c0_34 = arith.constant 0 : index
    %24 = vector.load %arg3[%c0_32, %c3, %c0_33, %c0_34] : memref<1x4x128x64xf32, #tpu.memory_space<vmem>>, vector<1x1x128x64xf32>
    %25 = vector.shape_cast %24 : vector<1x1x128x64xf32> to vector<128x64xf32>
    %c3_35 = arith.constant 3 : index
    %c0_36 = arith.constant 0 : index
    %c0_37 = arith.constant 0 : index
    %26 = vector.load %arg4[%c3_35, %c0_36, %c0_37] : memref<4x64x64xf32, #tpu.memory_space<vmem>>, vector<1x64x64xf32>
    %27 = vector.shape_cast %26 : vector<1x64x64xf32> to vector<64x64xf32>
    %cst_38 = arith.constant dense<0.000000e+00> : vector<128x64xf32>
    %28 = tpu.matmul %25, %27, %cst_38 {dimension_numbers = #tpu.dot_dimension_numbers<[1], [0], [0], [1], [0, 0, 1, 1], [], []>} : vector<128x64xf32>, vector<64x64xf32>, vector<128x64xf32> -> vector<128x64xf32>
    %c0_39 = arith.constant 0 : index
    %c3_40 = arith.constant 3 : index
    %c0_41 = arith.constant 0 : index
    %c0_42 = arith.constant 0 : index
    %29 = vector.load %arg5[%c0_39, %c3_40, %c0_41, %c0_42] : memref<1x4x128x64xf32, #tpu.memory_space<vmem>>, vector<1x1x128x64xf32>
    %30 = vector.shape_cast %29 : vector<1x1x128x64xf32> to vector<128x64xf32>
    %31 = vector.shape_cast %28 : vector<128x64xf32> to vector<1x1x128x64xf32>
    tpu.vector_store %arg5[%c0_39, %c3_40, %c0_41, %c0_42], %31 {strides = array<i32>} : memref<1x4x128x64xf32, #tpu.memory_space<vmem>>, vector<1x1x128x64xf32>,
    return
  }
  func.func @transform_0(%arg0: i32, %arg1: i32, %arg2: i32) -> (i32, i32, i32, i32) {
    %c0_i32 = arith.constant 0 : i32
    %c0_i32_0 = arith.constant 0 : i32
    return %arg1, %arg0, %arg2, %c0_i32 : i32, i32, i32, i32
  }
  func.func @transform_1(%arg0: i32, %arg1: i32, %arg2: i32) -> (i32, i32, i32) {
    %c0_i32 = arith.constant 0 : i32
    %c0_i32_0 = arith.constant 0 : i32
    %c0_i32_1 = arith.constant 0 : i32
    return %arg0, %c0_i32, %c0_i32_0 : i32, i32, i32
  }
  func.func @transform_2(%arg0: i32, %arg1: i32, %arg2: i32) -> (i32, i32, i32, i32) {
    %c0_i32 = arith.constant 0 : i32
    %c0_i32_0 = arith.constant 0 : i32
    return %arg1, %arg0, %arg2, %c0_i32 : i32, i32, i32, i32
  }
}

</mosaic_0001>

<bundles_post_ra>
// kernel: tpu_custom_call.1
= control target key start
LH: loop header
LB: loop body
LE: loop exit
PB: predicated region body
PF: predicated region fallthrough
CT: control target
= control target key end

     0   :  { %s1260_s9 = smov 0   ;;  %s1262_s10 = smov 0   ;;  %s1656_s0 = inlined_call_operand.vmem [shape: f32[2,4,128,64], index: 0, kind: input, shape index: {}]   ;;  %s1657_s1 = inlined_call_operand.vmem [shape: f32[4,64,64], index: 1, kind: input, shape index: {}]   ;;  %s1658_s2 = inlined_call_operand.vmem [shape: f32[2,4,128,64], index: 2, kind: output, shape index: {}]  }
   0x1   :  { %s1264_s11 = smov 0  }
   0x2 LB: > { %s27_s12 = sadd.s32 1, %s1239_s10  ;;  %p1004_p0 = scmp.ge.s32.totalorder %s1243_s11, 1  ;;  %s1243_s11 = sphi %s1264_s11, %s12_s11   ;;  %s1239_s10 = sphi %s1262_s10, %s1660_s10   ;;  %s1235_s9 = sphi %s1260_s9, %s1659_s9  }
   0x3   : > { %p29_p1 = scmp.ge.s32.totalorder %s27_s12, 2  ;;  %p162_p2 = scmp.lt.s32.totalorder %s1243_s11, 3 }
   0x5   : > { %s1662_s12 = smov (%p29_p1, %s27_s12), 0  ;;  %p163_p3 = pnand %p1004_p0, %p162_p2 }
   0x6   : > { %p210_p4 = scmp.lt.s32.totalorder (!%p163_p3), %s1235_s9, 1 }
   0x7   : > { %166 = sbr.rel (%p163_p3) target bundleno = 282 (0x11a), region = 28 }
   0xc   : > { %v1104_v0 = vld [vmem:[%s1657_s1 + $0xb8] sm:$0xff]  ;;  %v1103_v2 = vld [vmem:[%s1657_s1 + $0xb0] sm:$0xff]  ;;  %v1102_v4 = vld [vmem:[%s1657_s1 + $0xa8] sm:$0xff]  ;;  %s1664_s9 = smov (!%p210_p4, %s1235_s9), 1  ;;  %vm271_vm0 = vcmask 523264  }
   0xd   : > { %v1160_v1 = vld [vmem:[%s1657_s1 + $0xf8] sm:$0xff]  ;;  %639 = vmatpush.msra.mxu2 %v1104_v0  ;;  %v1159_v3 = vld [vmem:[%s1657_s1 + $0xf0] sm:$0xff]  ;;  %v1158_v5 = vld [vmem:[%s1657_s1 + $0xe8] sm:$0xff]  ;;  %s1195_s25 = sshll.u32 %s1664_s9, 9 }
   0xe   : > { %795 = vmatpush.msra.mxu3 %v1160_v1  ;;  %v270_v6 = vld [vmem:[%s1657_s1 + $0x38] sm:$0xff]  ;;  %v269_v8 = vld [vmem:[%s1657_s1 + $0x30] sm:$0xff]  ;;  %v1101_v10 = vld [vmem:[%s1657_s1 + $0xa0] sm:$0xff]  ;;  %s1358_s16 = scalar_lea.vmem %s1656_s0, %s1195_s25  ;;  %s1517_s8 = scalar_lea.vmem %s1658_s2, %s1195_s25 }
   0xf   : > { %v1048_v7 = vld [vmem:[%s1657_s1 + $0x78] sm:$0xff]  ;;  %640 = vmatpush.msra.mxu2 %v1103_v2  ;;  %v1047_v9 = vld [vmem:[%s1657_s1 + $0x70] sm:$0xff]  ;;  %328 = vmatpush.msra.mxu0 %v270_v6  ;;  %v1157_v11 = vld [vmem:[%s1657_s1 + $0xe0] sm:$0xff] }
  0x10   : > { %796 = vmatpush.msra.mxu3 %v1159_v3  ;;  %483 = vmatpush.msra.mxu1 %v1048_v7  ;;  %v268_v12 = vld [vmem:[%s1657_s1 + $0x28] sm:$0xff]  ;;  %v1100_v14 = vld [vmem:[%s1657_s1 + $0x98] sm:$0xff]  ;;  %v267_v16 = vld [vmem:[%s1657_s1 + $0x20] sm:$0xff] }
  0x11   : > { %641 = vmatpush.msra.mxu2 %v1102_v4  ;;  %v1046_v13 = vld [vmem:[%s1657_s1 + $0x68] sm:$0xff]  ;;  %329 = vmatpush.msra.mxu0 %v269_v8  ;;  %v1156_v15 = vld [vmem:[%s1657_s1 + $0xd8] sm:$0xff]  ;;  %v1045_v17 = vld [vmem:[%s1657_s1 + $0x60] sm:$0xff] }
  0x12   : > { %797 = vmatpush.msra.mxu3 %v1158_v5  ;;  %484 = vmatpush.msra.mxu1 %v1047_v9  ;;  %v1099_v18 = vld [vmem:[%s1657_s1 + $0x90] sm:$0xff]  ;;  %v266_v20 = vld [vmem:[%s1657_s1 + $0x18] sm:$0xff]  ;;  %v1098_v22 = vld [vmem:[%s1657_s1 + $0x88] sm:$0xff] }
  0x13   : > { %642 = vmatpush.msra.mxu2 %v1101_v10  ;;  %330 = vmatpush.msra.mxu0 %v268_v12  ;;  %v1155_v19 = vld [vmem:[%s1657_s1 + $0xd0] sm:$0xff]  ;;  %v1044_v21 = vld [vmem:[%s1657_s1 + $0x58] sm:$0xff]  ;;  %v1154_v23 = vld [vmem:[%s1657_s1 + $0xc8] sm:$0xff] }
  0x14   : > { %798 = vmatpush.msra.mxu3 %v1157_v11  ;;  %485 = vmatpush.msra.mxu1 %v1046_v13  ;;  %v265_v24 = vld [vmem:[%s1657_s1 + $0x10] sm:$0xff]  ;;  %v1097_v26 = vld [vmem:[%s1657_s1 + $0x80] sm:$0xff]  ;;  %v264_v30 = vld [vmem:[%s1657_s1 + $0x8] sm:$0xff] }
  0x15   : > { %643 = vmatpush.msra.mxu2 %v1100_v14  ;;  %331 = vmatpush.msra.mxu0 %v267_v16  ;;  %v1043_v25 = vld [vmem:[%s1657_s1 + $0x50] sm:$0xff]  ;;  %v1153_v27 = vld [vmem:[%s1657_s1 + $0xc0] sm:$0xff]  ;;  %v1042_v31 = vld [vmem:[%s1657_s1 + $0x48] sm:$0xff] }
  0x16   : > { %799 = vmatpush.msra.mxu3 %v1156_v15  ;;  %486 = vmatpush.msra.mxu1 %v1045_v17  ;;  %v1081_v28 = vld [vmem:[%s1358_s16 + $0x100] sm:$0xff]  ;;  %v1082_v36 = vld [vmem:[%s1358_s16 + $0x108] sm:$0xff]  ;;  %v1083_v40 = vld [vmem:[%s1358_s16 + $0x110] sm:$0xff] }
  0x17   : > { %644 = vmatpush.msra.mxu2 %v1099_v18  ;;  %332 = vmatpush.msra.mxu0 %v266_v20  ;;  %v1137_v29 = vld [vmem:[%s1358_s16 + $0x180] sm:$0xff]  ;;  %v1138_v37 = vld [vmem:[%s1358_s16 + $0x188] sm:$0xff]  ;;  %v1139_v41 = vld [vmem:[%s1358_s16 + $0x190] sm:$0xff] }
  0x18   : > { %800 = vmatpush.msra.mxu3 %v1155_v19  ;;  %487 = vmatpush.msra.mxu1 %v1044_v21  ;;  %v263_v32 = vld [vmem:[%s1657_s1] sm:$0xff]  ;;  %v248_v38 = vld [vmem:[%s1358_s16 + $0x8] sm:$0xff]  ;;  %v249_v42 = vld [vmem:[%s1358_s16 + $0x10] sm:$0xff] }
  0x19   : > { %645 = vmatpush.msra.mxu2 %v1098_v22  ;;  %333 = vmatpush.msra.mxu0 %v265_v24  ;;  %v1041_v33 = vld [vmem:[%s1657_s1 + $0x40] sm:$0xff]  ;;  %v1026_v39 = vld [vmem:[%s1358_s16 + $0x88] sm:$0xff]  ;;  %v1027_v43 = vld [vmem:[%s1358_s16 + $0x90] sm:$0xff] }
  0x1a   : > { %801 = vmatpush.msra.mxu3 %v1154_v23  ;;  %488 = vmatpush.msra.mxu1 %v1043_v25  ;;  %v247_v34 = vld [vmem:[%s1358_s16] sm:$0xff]  ;;  %v1084_v44 = vld [vmem:[%s1358_s16 + $0x118] sm:$0xff]  ;;  %v1086_v52 = vld [vmem:[%s1358_s16 + $0x128] sm:$0xff] }
  0x1b   : > { %646 = vmatpush.msra.mxu2 %v1097_v26  ;;  %334 = vmatpush.msra.mxu0 %v264_v30  ;;  %v1025_v35 = vld [vmem:[%s1358_s16 + $0x80] sm:$0xff]  ;;  %v1140_v45 = vld [vmem:[%s1358_s16 + $0x198] sm:$0xff]  ;;  %v1142_v53 = vld [vmem:[%s1358_s16 + $0x1a8] sm:$0xff] }
  0x1c   : > { %802 = vmatpush.msra.mxu3 %v1153_v27  ;;  %1105 = vmatmul.msk.f32.vlgmr.msra.gmra.mxu2 %vm271_vm0, %v1081_v28  ;;  %v250_v46 = vld [vmem:[%s1358_s16 + $0x18] sm:$0xff]  ;;  %v1085_v48 = vld [vmem:[%s1358_s16 + $0x120] sm:$0xff]  ;;  %v252_v54 = vld [vmem:[%s1358_s16 + $0x28] sm:$0xff] }
  0x1d   : > { %1161 = vmatmul.msk.f32.vlgmr.msra.gmra.mxu3 %vm271_vm0, %v1137_v29  ;;  %489 = vmatpush.msra.mxu1 %v1042_v31  ;;  %v1028_v47 = vld [vmem:[%s1358_s16 + $0x98] sm:$0xff]  ;;  %v1141_v49 = vld [vmem:[%s1358_s16 + $0x1a0] sm:$0xff]  ;;  %v1030_v55 = vld [vmem:[%s1358_s16 + $0xa8] sm:$0xff] }
  0x1e   : > { %335 = vmatpush.msra.mxu0 %v263_v32  ;;  %v251_v50 = vld [vmem:[%s1358_s16 + $0x20] sm:$0xff]  ;;  %v1087_v56 = vld [vmem:[%s1358_s16 + $0x130] sm:$0xff]  ;;  %v1088_v60 = vld [vmem:[%s1358_s16 + $0x138] sm:$0xff] }
  0x1f   : > { %490 = vmatpush.msra.mxu1 %v1041_v33  ;;  %1009 = vmatmul.msk.f32.vlgmr.msra.gmra.mxu0 %vm271_vm0, %v247_v34  ;;  %v1029_v51 = vld [vmem:[%s1358_s16 + $0xa0] sm:$0xff]  ;;  %v1143_v57 = vld [vmem:[%s1358_s16 + $0x1b0] sm:$0xff]  ;;  %v1144_v61 = vld [vmem:[%s1358_s16 + $0x1b8] sm:$0xff] }
  0x20   : > { %1049 = vmatmul.msk.f32.vlgmr.msra.gmra.mxu1 %vm271_vm0, %v1025_v35  ;;  %v253_v58 = vld [vmem:[%s1358_s16 + $0x30] sm:$0xff]  ;;  %v254_v62 = vld [vmem:[%s1358_s16 + $0x38] sm:$0xff]  ;;  %v1089_v0 = vld [vmem:[%s1358_s16 + $0x140] sm:$0xff] }
  0x21   : > { %v1031_v59 = vld [vmem:[%s1358_s16 + $0xb0] sm:$0xff]  ;;  %v1032_v63 = vld [vmem:[%s1358_s16 + $0xb8] sm:$0xff]  ;;  %v1145_v1 = vld [vmem:[%s1358_s16 + $0x1c0] sm:$0xff] }
  0x22   : > { %v255_v2 = vld [vmem:[%s1358_s16 + $0x40] sm:$0xff]  ;;  %v1090_v4 = vld [vmem:[%s1358_s16 + $0x148] sm:$0xff]  ;;  %v1091_v8 = vld [vmem:[%s1358_s16 + $0x150] sm:$0xff] }
  0x23   : > { %v1033_v3 = vld [vmem:[%s1358_s16 + $0xc0] sm:$0xff]  ;;  %v1146_v5 = vld [vmem:[%s1358_s16 + $0x1c8] sm:$0xff]  ;;  %v1147_v9 = vld [vmem:[%s1358_s16 + $0x1d0] sm:$0xff] }
  0x24   : > { %1106 = vmatmul.msk.f32.gmra.mxu2 %vm271_vm0, %v1082_v36  ;;  %v256_v6 = vld [vmem:[%s1358_s16 + $0x48] sm:$0xff]  ;;  %v257_v10 = vld [vmem:[%s1358_s16 + $0x50] sm:$0xff]  ;;  %v1092_v12 = vld [vmem:[%s1358_s16 + $0x158] sm:$0xff] }
  0x25   : > { %1162 = vmatmul.msk.f32.gmra.mxu3 %vm271_vm0, %v1138_v37  ;;  %v1034_v7 = vld [vmem:[%s1358_s16 + $0xc8] sm:$0xff]  ;;  %v1035_v11 = vld [vmem:[%s1358_s16 + $0xd0] sm:$0xff]  ;;  %v1148_v13 = vld [vmem:[%s1358_s16 + $0x1d8] sm:$0xff] }
  0x26   : > { %v258_v14 = vld [vmem:[%s1358_s16 + $0x58] sm:$0xff]  ;;  %v1093_v16 = vld [vmem:[%s1358_s16 + $0x160] sm:$0xff]  ;;  %v1094_v20 = vld [vmem:[%s1358_s16 + $0x168] sm:$0xff] }
  0x27   : > { %1010 = vmatmul.msk.f32.gmra.mxu0 %vm271_vm0, %v248_v38  ;;  %v1036_v15 = vld [vmem:[%s1358_s16 + $0xd8] sm:$0xff]  ;;  %v1149_v17 = vld [vmem:[%s1358_s16 + $0x1e0] sm:$0xff]  ;;  %v1150_v21 = vld [vmem:[%s1358_s16 + $0x1e8] sm:$0xff] }
  0x28   : > { %1050 = vmatmul.msk.f32.gmra.mxu1 %vm271_vm0, %v1026_v39  ;;  %v259_v18 = vld [vmem:[%s1358_s16 + $0x60] sm:$0xff]  ;;  %v260_v22 = vld [vmem:[%s1358_s16 + $0x68] sm:$0xff]  ;;  %v1095_v24 = vld [vmem:[%s1358_s16 + $0x170] sm:$0xff] }
  0x29   : > { %v1037_v19 = vld [vmem:[%s1358_s16 + $0xe0] sm:$0xff]  ;;  %v1038_v23 = vld [vmem:[%s1358_s16 + $0xe8] sm:$0xff]  ;;  %v1151_v25 = vld [vmem:[%s1358_s16 + $0x1f0] sm:$0xff] }
  0x2a   : > { %v261_v26 = vld [vmem:[%s1358_s16 + $0x70] sm:$0xff]  ;;  %v1096_v28 = vld [vmem:[%s1358_s16 + $0x178] sm:$0xff] }
  0x2b   : > { %v1039_v27 = vld [vmem:[%s1358_s16 + $0xf0] sm:$0xff]  ;;  %v1152_v29 = vld [vmem:[%s1358_s16 + $0x1f8] sm:$0xff] }
  0x2c   : > { %1107 = vmatmul.msk.f32.gmra.mxu2 %vm271_vm0, %v1083_v40  ;;  %v262_v30 = vld [vmem:[%s1358_s16 + $0x78] sm:$0xff] }
  0x2d   : > { %1163 = vmatmul.msk.f32.gmra.mxu3 %vm271_vm0, %v1139_v41  ;;  %v1040_v31 = vld [vmem:[%s1358_s16 + $0xf8] sm:$0xff] }
  0x2f   : > { %1011 = vmatmul.msk.f32.gmra.mxu0 %vm271_vm0, %v249_v42 }
  0x30   : > { %1051 = vmatmul.msk.f32.gmra.mxu1 %vm271_vm0, %v1027_v43 }
  0x34   : > { %1108 = vmatmul.msk.f32.gmra.mxu2 %vm271_vm0, %v1084_v44 }
  0x35   : > { %1164 = vmatmul.msk.f32.gmra.mxu3 %vm271_vm0, %v1140_v45 }
  0x37   : > { %1012 = vmatmul.msk.f32.gmra.mxu0 %vm271_vm0, %v250_v46 }
  0x38   : > { %1052 = vmatmul.msk.f32.gmra.mxu1 %vm271_vm0, %v1028_v47 }
  0x3c   : > { %1109 = vmatmul.msk.f32.gmra.mxu2 %vm271_vm0, %v1085_v48 }
  0x3d   : > { %1165 = vmatmul.msk.f32.gmra.mxu3 %vm271_vm0, %v1141_v49 }
  0x3f   : > { %1013 = vmatmul.msk.f32.gmra.mxu0 %vm271_vm0, %v251_v50 }
  0x40   : > { %1053 = vmatmul.msk.f32.gmra.mxu1 %vm271_vm0, %v1029_v51 }
  0x44   : > { %1110 = vmatmul.msk.f32.gmra.mxu2 %vm271_vm0, %v1086_v52 }
  0x45   : > { %1166 = vmatmul.msk.f32.gmra.mxu3 %vm271_vm0, %v1142_v53 }
  0x47   : > { %1014 = vmatmul.msk.f32.gmra.mxu0 %vm271_vm0, %v252_v54 }
  0x48   : > { %1054 = vmatmul.msk.f32.gmra.mxu1 %vm271_vm0, %v1030_v55 }
  0x4c   : > { %1111 = vmatmul.msk.f32.gmra.mxu2 %vm271_vm0, %v1087_v56 }
  0x4d   : > { %1167 = vmatmul.msk.f32.gmra.mxu3 %vm271_vm0, %v1143_v57 }
  0x4f   : > { %1015 = vmatmul.msk.f32.gmra.mxu0 %vm271_vm0, %v253_v58 }
  0x50   : > { %1055 = vmatmul.msk.f32.gmra.mxu1 %vm271_vm0, %v1031_v59 }
  0x54   : > { %1112 = vmatmul.msk.f32.gmra.mxu2 %vm271_vm0, %v1088_v60 }
  0x55   : > { %1168 = vmatmul.msk.f32.gmra.mxu3 %vm271_vm0, %v1144_v61 }
  0x57   : > { %1016 = vmatmul.msk.f32.gmra.mxu0 %vm271_vm0, %v254_v62 }
  0x58   : > { %1056 = vmatmul.msk.f32.gmra.mxu1 %vm271_vm0, %v1032_v63 }
  0x5c   : > { %1113 = vmatmul.msk.f32.gmra.mxu2 %vm271_vm0, %v1089_v0 }
  0x5d   : > { %1169 = vmatmul.msk.f32.gmra.mxu3 %vm271_vm0, %v1145_v1 }
  0x5f   : > { %1017 = vmatmul.msk.f32.gmra.mxu0 %vm271_vm0, %v255_v2 }
  0x60   : > { %1057 = vmatmul.msk.f32.gmra.mxu1 %vm271_vm0, %v1033_v3 }
  0x64   : > { %1114 = vmatmul.msk.f32.gmra.mxu2 %vm271_vm0, %v1090_v4 }
  0x65   : > { %1170 = vmatmul.msk.f32.gmra.mxu3 %vm271_vm0, %v1146_v5 }
  0x67   : > { %1018 = vmatmul.msk.f32.gmra.mxu0 %vm271_vm0, %v256_v6 }
  0x68   : > { %1058 = vmatmul.msk.f32.gmra.mxu1 %vm271_vm0, %v1034_v7 }
  0x6c   : > { %1115 = vmatmul.msk.f32.gmra.mxu2 %vm271_vm0, %v1091_v8 }
  0x6d   : > { %1171 = vmatmul.msk.f32.gmra.mxu3 %vm271_vm0, %v1147_v9 }
  0x6f   : > { %1019 = vmatmul.msk.f32.gmra.mxu0 %vm271_vm0, %v257_v10 }
  0x70   : > { %1059 = vmatmul.msk.f32.gmra.mxu1 %vm271_vm0, %v1035_v11 }
  0x74   : > { %1116 = vmatmul.msk.f32.gmra.mxu2 %vm271_vm0, %v1092_v12 }
  0x75   : > { %1172 = vmatmul.msk.f32.gmra.mxu3 %vm271_vm0, %v1148_v13 }
  0x77   : > { %1020 = vmatmul.msk.f32.gmra.mxu0 %vm271_vm0, %v258_v14 }
  0x78   : > { %1060 = vmatmul.msk.f32.gmra.mxu1 %vm271_vm0, %v1036_v15 }
  0x7c   : > { %1117 = vmatmul.msk.f32.gmra.mxu2 %vm271_vm0, %v1093_v16 }
  0x7d   : > { %1173 = vmatmul.msk.f32.gmra.mxu3 %vm271_vm0, %v1149_v17 }
  0x7f   : > { %1021 = vmatmul.msk.f32.gmra.mxu0 %vm271_vm0, %v259_v18 }
  0x80   : > { %1061 = vmatmul.msk.f32.gmra.mxu1 %vm271_vm0, %v1037_v19 }
  0x84   : > { %1118 = vmatmul.msk.f32.gmra.mxu2 %vm271_vm0, %v1094_v20 }
  0x85   : > { %1174 = vmatmul.msk.f32.gmra.mxu3 %vm271_vm0, %v1150_v21 }
  0x87   : > { %1022 = vmatmul.msk.f32.gmra.mxu0 %vm271_vm0, %v260_v22 }
  0x88   : > { %1062 = vmatmul.msk.f32.gmra.mxu1 %vm271_vm0, %v1038_v23 }
  0x8c   : > { %1119 = vmatmul.msk.f32.gmra.mxu2 %vm271_vm0, %v1095_v24 }
  0x8d   : > { %1175 = vmatmul.msk.f32.gmra.mxu3 %vm271_vm0, %v1151_v25 }
  0x8f   : > { %1023 = vmatmul.msk.f32.gmra.mxu0 %vm271_vm0, %v261_v26 }
  0x90   : > { %1063 = vmatmul.msk.f32.gmra.mxu1 %vm271_vm0, %v1039_v27 }
  0x94   : > { %1120 = vmatmul.msk.f32.gmra.mxu2 %vm271_vm0, %v1096_v28 }
  0x95   : > { %1176 = vmatmul.msk.f32.gmra.mxu3 %vm271_vm0, %v1152_v29 }
  0x97   : > { %1024 = vmatmul.msk.f32.gmra.mxu0 %vm271_vm0, %v262_v30 }
  0x98   : > { %1064 = vmatmul.msk.f32.gmra.mxu1 %vm271_vm0, %v1040_v31 }
  0x9c   : > { %v337_v32 = vpop.f32.mrf.mxu0 }
  0x9d   : > { %v492_v33 = vpop.f32.mrf.mxu1  ;;  %385 = vst.msk [vmem:[%s1517_s8] sm:$0xff] %vm271_vm0, %v337_v32 }
  0x9e   : > { %1065 = vst.msk [vmem:[%s1517_s8 + $0x80] sm:$0xff] %vm271_vm0, %v492_v33 }
  0x9f   : > { %v648_v34 = vpop.f32.mrf.mxu2 }
  0xa0   : > { %v804_v35 = vpop.f32.mrf.mxu3  ;;  %1121 = vst.msk [vmem:[%s1517_s8 + $0x100] sm:$0xff] %vm271_vm0, %v648_v34 }
  0xa1   : > { %1177 = vst.msk [vmem:[%s1517_s8 + $0x180] sm:$0xff] %vm271_vm0, %v804_v35 }
  0xa4   : > { %v340_v36 = vpop.f32.mrf.mxu0 }
  0xa5   : > { %v495_v37 = vpop.f32.mrf.mxu1  ;;  %386 = vst.msk [vmem:[%s1517_s8 + $0x8] sm:$0xff] %vm271_vm0, %v340_v36 }
  0xa6   : > { %1066 = vst.msk [vmem:[%s1517_s8 + $0x88] sm:$0xff] %vm271_vm0, %v495_v37 }
  0xa7   : > { %v651_v38 = vpop.f32.mrf.mxu2 }
  0xa8   : > { %v807_v39 = vpop.f32.mrf.mxu3  ;;  %1122 = vst.msk [vmem:[%s1517_s8 + $0x108] sm:$0xff] %vm271_vm0, %v651_v38 }
  0xa9   : > { %1178 = vst.msk [vmem:[%s1517_s8 + $0x188] sm:$0xff] %vm271_vm0, %v807_v39 }
  0xac   : > { %v343_v40 = vpop.f32.mrf.mxu0 }
  0xad   : > { %v498_v41 = vpop.f32.mrf.mxu1  ;;  %387 = vst.msk [vmem:[%s1517_s8 + $0x10] sm:$0xff] %vm271_vm0, %v343_v40 }
  0xae   : > { %1067 = vst.msk [vmem:[%s1517_s8 + $0x90] sm:$0xff] %vm271_vm0, %v498_v41 }
  0xaf   : > { %v654_v42 = vpop.f32.mrf.mxu2 }
  0xb0   : > { %v810_v43 = vpop.f32.mrf.mxu3  ;;  %1123 = vst.msk [vmem:[%s1517_s8 + $0x110] sm:$0xff] %vm271_vm0, %v654_v42 }
  0xb1   : > { %1179 = vst.msk [vmem:[%s1517_s8 + $0x190] sm:$0xff] %vm271_vm0, %v810_v43 }
  0xb4   : > { %v346_v44 = vpop.f32.mrf.mxu0 }
  0xb5   : > { %v501_v45 = vpop.f32.mrf.mxu1  ;;  %388 = vst.msk [vmem:[%s1517_s8 + $0x18] sm:$0xff] %vm271_vm0, %v346_v44 }
  0xb6   : > { %1068 = vst.msk [vmem:[%s1517_s8 + $0x98] sm:$0xff] %vm271_vm0, %v501_v45 }
  0xb7   : > { %v657_v46 = vpop.f32.mrf.mxu2 }
  0xb8   : > { %v813_v47 = vpop.f32.mrf.mxu3  ;;  %1124 = vst.msk [vmem:[%s1517_s8 + $0x118] sm:$0xff] %vm271_vm0, %v657_v46 }
  0xb9   : > { %1180 = vst.msk [vmem:[%s1517_s8 + $0x198] sm:$0xff] %vm271_vm0, %v813_v47 }
  0xbc   : > { %v349_v48 = vpop.f32.mrf.mxu0 }
  0xbd   : > { %v504_v49 = vpop.f32.mrf.mxu1  ;;  %389 = vst.msk [vmem:[%s1517_s8 + $0x20] sm:$0xff] %vm271_vm0, %v349_v48 }
  0xbe   : > { %1069 = vst.msk [vmem:[%s1517_s8 + $0xa0] sm:$0xff] %vm271_vm0, %v504_v49 }
  0xbf   : > { %v660_v50 = vpop.f32.mrf.mxu2 }
  0xc0   : > { %v816_v51 = vpop.f32.mrf.mxu3  ;;  %1125 = vst.msk [vmem:[%s1517_s8 + $0x120] sm:$0xff] %vm271_vm0, %v660_v50 }
  0xc1   : > { %1181 = vst.msk [vmem:[%s1517_s8 + $0x1a0] sm:$0xff] %vm271_vm0, %v816_v51 }
  0xc4   : > { %v352_v52 = vpop.f32.mrf.mxu0 }
  0xc5   : > { %v507_v53 = vpop.f32.mrf.mxu1  ;;  %390 = vst.msk [vmem:[%s1517_s8 + $0x28] sm:$0xff] %vm271_vm0, %v352_v52 }
  0xc6   : > { %1070 = vst.msk [vmem:[%s1517_s8 + $0xa8] sm:$0xff] %vm271_vm0, %v507_v53 }
  0xc7   : > { %v663_v54 = vpop.f32.mrf.mxu2 }
  0xc8   : > { %v819_v55 = vpop.f32.mrf.mxu3  ;;  %1126 = vst.msk [vmem:[%s1517_s8 + $0x128] sm:$0xff] %vm271_vm0, %v663_v54 }
  0xc9   : > { %1182 = vst.msk [vmem:[%s1517_s8 + $0x1a8] sm:$0xff] %vm271_vm0, %v819_v55 }
  0xcc   : > { %v355_v56 = vpop.f32.mrf.mxu0 }
  0xcd   : > { %v510_v57 = vpop.f32.mrf.mxu1  ;;  %391 = vst.msk [vmem:[%s1517_s8 + $0x30] sm:$0xff] %vm271_vm0, %v355_v56 }
  0xce   : > { %1071 = vst.msk [vmem:[%s1517_s8 + $0xb0] sm:$0xff] %vm271_vm0, %v510_v57 }
  0xcf   : > { %v666_v58 = vpop.f32.mrf.mxu2 }
  0xd0   : > { %v822_v59 = vpop.f32.mrf.mxu3  ;;  %1127 = vst.msk [vmem:[%s1517_s8 + $0x130] sm:$0xff] %vm271_vm0, %v666_v58 }
  0xd1   : > { %1183 = vst.msk [vmem:[%s1517_s8 + $0x1b0] sm:$0xff] %vm271_vm0, %v822_v59 }
  0xd4   : > { %v358_v60 = vpop.f32.mrf.mxu0 }
  0xd5   : > { %v513_v61 = vpop.f32.mrf.mxu1  ;;  %392 = vst.msk [vmem:[%s1517_s8 + $0x38] sm:$0xff] %vm271_vm0, %v358_v60 }
  0xd6   : > { %1072 = vst.msk [vmem:[%s1517_s8 + $0xb8] sm:$0xff] %vm271_vm0, %v513_v61 }
  0xd7   : > { %v669_v62 = vpop.f32.mrf.mxu2 }
  0xd8   : > { %v825_v63 = vpop.f32.mrf.mxu3  ;;  %1128 = vst.msk [vmem:[%s1517_s8 + $0x138] sm:$0xff] %vm271_vm0, %v669_v62 }
  0xd9   : > { %1184 = vst.msk [vmem:[%s1517_s8 + $0x1b8] sm:$0xff] %vm271_vm0, %v825_v63 }
  0xdc   : > { %v361_v0 = vpop.f32.mrf.mxu0 }
  0xdd   : > { %v516_v1 = vpop.f32.mrf.mxu1  ;;  %393 = vst.msk [vmem:[%s1517_s8 + $0x40] sm:$0xff] %vm271_vm0, %v361_v0 }
  0xde   : > { %1073 = vst.msk [vmem:[%s1517_s8 + $0xc0] sm:$0xff] %vm271_vm0, %v516_v1 }
  0xdf   : > { %v672_v2 = vpop.f32.mrf.mxu2 }
  0xe0   : > { %v828_v3 = vpop.f32.mrf.mxu3  ;;  %1129 = vst.msk [vmem:[%s1517_s8 + $0x140] sm:$0xff] %vm271_vm0, %v672_v2 }
  0xe1   : > { %1185 = vst.msk [vmem:[%s1517_s8 + $0x1c0] sm:$0xff] %vm271_vm0, %v828_v3 }
  0xe4   : > { %v364_v4 = vpop.f32.mrf.mxu0 }
  0xe5   : > { %v519_v5 = vpop.f32.mrf.mxu1  ;;  %394 = vst.msk [vmem:[%s1517_s8 + $0x48] sm:$0xff] %vm271_vm0, %v364_v4 }
  0xe6   : > { %1074 = vst.msk [vmem:[%s1517_s8 + $0xc8] sm:$0xff] %vm271_vm0, %v519_v5 }
  0xe7   : > { %v675_v6 = vpop.f32.mrf.mxu2 }
  0xe8   : > { %v831_v7 = vpop.f32.mrf.mxu3  ;;  %1130 = vst.msk [vmem:[%s1517_s8 + $0x148] sm:$0xff] %vm271_vm0, %v675_v6 }
  0xe9   : > { %1186 = vst.msk [vmem:[%s1517_s8 + $0x1c8] sm:$0xff] %vm271_vm0, %v831_v7 }
  0xec   : > { %v367_v8 = vpop.f32.mrf.mxu0 }
  0xed   : > { %v522_v9 = vpop.f32.mrf.mxu1  ;;  %395 = vst.msk [vmem:[%s1517_s8 + $0x50] sm:$0xff] %vm271_vm0, %v367_v8 }
  0xee   : > { %1075 = vst.msk [vmem:[%s1517_s8 + $0xd0] sm:$0xff] %vm271_vm0, %v522_v9 }
  0xef   : > { %v678_v10 = vpop.f32.mrf.mxu2 }
  0xf0   : > { %v834_v11 = vpop.f32.mrf.mxu3  ;;  %1131 = vst.msk [vmem:[%s1517_s8 + $0x150] sm:$0xff] %vm271_vm0, %v678_v10 }
  0xf1   : > { %1187 = vst.msk [vmem:[%s1517_s8 + $0x1d0] sm:$0xff] %vm271_vm0, %v834_v11 }
  0xf4   : > { %v370_v12 = vpop.f32.mrf.mxu0 }
  0xf5   : > { %v525_v13 = vpop.f32.mrf.mxu1  ;;  %396 = vst.msk [vmem:[%s1517_s8 + $0x58] sm:$0xff] %vm271_vm0, %v370_v12 }
  0xf6   : > { %1076 = vst.msk [vmem:[%s1517_s8 + $0xd8] sm:$0xff] %vm271_vm0, %v525_v13 }
  0xf7   : > { %v681_v14 = vpop.f32.mrf.mxu2 }
  0xf8   : > { %v837_v15 = vpop.f32.mrf.mxu3  ;;  %1132 = vst.msk [vmem:[%s1517_s8 + $0x158] sm:$0xff] %vm271_vm0, %v681_v14 }
  0xf9   : > { %1188 = vst.msk [vmem:[%s1517_s8 + $0x1d8] sm:$0xff] %vm271_vm0, %v837_v15 }
  0xfc   : > { %v373_v16 = vpop.f32.mrf.mxu0 }
  0xfd   : > { %v528_v17 = vpop.f32.mrf.mxu1  ;;  %397 = vst.msk [vmem:[%s1517_s8 + $0x60] sm:$0xff] %vm271_vm0, %v373_v16 }
  0xfe   : > { %1077 = vst.msk [vmem:[%s1517_s8 + $0xe0] sm:$0xff] %vm271_vm0, %v528_v17 }
  0xff   : > { %v684_v18 = vpop.f32.mrf.mxu2 }
 0x100   : > { %v840_v19 = vpop.f32.mrf.mxu3  ;;  %1133 = vst.msk [vmem:[%s1517_s8 + $0x160] sm:$0xff] %vm271_vm0, %v684_v18 }
 0x101   : > { %1189 = vst.msk [vmem:[%s1517_s8 + $0x1e0] sm:$0xff] %vm271_vm0, %v840_v19 }
 0x104   : > { %v376_v20 = vpop.f32.mrf.mxu0 }
 0x105   : > { %v531_v21 = vpop.f32.mrf.mxu1  ;;  %398 = vst.msk [vmem:[%s1517_s8 + $0x68] sm:$0xff] %vm271_vm0, %v376_v20 }
 0x106   : > { %1078 = vst.msk [vmem:[%s1517_s8 + $0xe8] sm:$0xff] %vm271_vm0, %v531_v21 }
 0x107   : > { %v687_v22 = vpop.f32.mrf.mxu2 }
 0x108   : > { %v843_v23 = vpop.f32.mrf.mxu3  ;;  %1134 = vst.msk [vmem:[%s1517_s8 + $0x168] sm:$0xff] %vm271_vm0, %v687_v22 }
 0x109   : > { %1190 = vst.msk [vmem:[%s1517_s8 + $0x1e8] sm:$0xff] %vm271_vm0, %v843_v23 }
 0x10c   : > { %v379_v24 = vpop.f32.mrf.mxu0 }
 0x10d   : > { %v534_v25 = vpop.f32.mrf.mxu1  ;;  %399 = vst.msk [vmem:[%s1517_s8 + $0x70] sm:$0xff] %vm271_vm0, %v379_v24 }
 0x10e   : > { %1079 = vst.msk [vmem:[%s1517_s8 + $0xf0] sm:$0xff] %vm271_vm0, %v534_v25 }
 0x10f   : > { %v690_v26 = vpop.f32.mrf.mxu2 }
 0x110   : > { %v846_v27 = vpop.f32.mrf.mxu3  ;;  %1135 = vst.msk [vmem:[%s1517_s8 + $0x170] sm:$0xff] %vm271_vm0, %v690_v26 }
 0x111   : > { %1191 = vst.msk [vmem:[%s1517_s8 + $0x1f0] sm:$0xff] %vm271_vm0, %v846_v27 }
 0x114   : > { %v382_v28 = vpop.f32.mrf.mxu0 }
 0x115   : > { %v537_v29 = vpop.f32.mrf.mxu1  ;;  %400 = vst.msk [vmem:[%s1517_s8 + $0x78] sm:$0xff] %vm271_vm0, %v382_v28 }
 0x116   : > { %1080 = vst.msk [vmem:[%s1517_s8 + $0xf8] sm:$0xff] %vm271_vm0, %v537_v29 }
 0x117   : > { %v693_v30 = vpop.f32.mrf.mxu2 }
 0x118   : > { %v849_v31 = vpop.f32.mrf.mxu3  ;;  %1136 = vst.msk [vmem:[%s1517_s8 + $0x178] sm:$0xff] %vm271_vm0, %v693_v30 }
 0x119   : > { %1192 = vst.msk [vmem:[%s1517_s8 + $0x1f8] sm:$0xff] %vm271_vm0, %v849_v31 }
 0x11a PF: > { %s12_s11 = sadd.s32 1, %s1243_s11   ;;  %s1659_s9 = smov %s1239_s10 }
 0x11b   : > { %p9_p5 = scmp.ge.s32.totalorder %s12_s11, 4   ;;  %s1660_s10 = smov %s1662_s12 }
 0x11d   :  { %11 = sbr.rel (!%p9_p5) target bundleno = 2 (0x2), region = 70 }

</bundles_post_ra>
